<compile_context>
chip_gen: v7x
topology: tpu7x:2x2x1
jax: 0.10.0
libtpu: 0.0.40
codegen_flags: <defaults>
</compile_context>

<pallas_src>
import jax
import jax.numpy as jnp
from jax.experimental import pallas as pl
from jax.experimental.pallas import tpu as pltpu

SUBLANE = 8      # vreg sublane width — batch tiles are multiples of this
TB_MAX = 2048    # max batch-tile rows per grid step (DMAs >= ~0.5 MiB)


def _cdiv(a, b):
    return (a + b - 1) // b


def _round_up(x, m):
    return ((x + m - 1) // m) * m


def mlp_kernel(x_ref, w1_ref, b1_ref, w2_ref, b2_ref, w3_ref, b3_ref, o_ref):
    # Cast the activation tile to bf16 in-kernel (operands on the MXU), f32 acc.
    x = x_ref[...].astype(jnp.bfloat16)
    # fc1 + ReLU (elementwise in f32: safe on v5e, hidden under HBM anyway)
    h1 = jnp.dot(x, w1_ref[...], preferred_element_type=jnp.float32)
    h1 = jnp.maximum(h1 + b1_ref[...], 0.0)
    # fc2 + ReLU
    h2 = jnp.dot(h1.astype(jnp.bfloat16), w2_ref[...],
                 preferred_element_type=jnp.float32)
    h2 = jnp.maximum(h2 + b2_ref[...], 0.0)
    # fc3 (no activation)
    out = jnp.dot(h2.astype(jnp.bfloat16), w3_ref[...],
                  preferred_element_type=jnp.float32)
    o_ref[...] = (out + b3_ref[...]).astype(o_ref.dtype)


def prepare_params(params):
    """One-time weight prep: cast matmul operands to bf16. Biases stay f32."""
    return {
        "w1": params["w1"].astype(jnp.bfloat16), "b1": params["b1"],
        "w2": params["w2"].astype(jnp.bfloat16), "b2": params["b2"],
        "w3": params["w3"].astype(jnp.bfloat16), "b3": params["b3"],
    }


def net_forward(x, prepared):
    """Fused 3-layer MLP forward.

    x: [B, input_size] float32
    prepared: output of prepare_params() — bf16 weights [in, out], f32 biases [1, out]
    returns: [B, output_size] float32
    """
    w1, b1 = prepared["w1"], prepared["b1"]
    w2, b2 = prepared["w2"], prepared["b2"]
    w3, b3 = prepared["w3"], prepared["b3"]

    B, in_size = x.shape
    out_size = w3.shape[1]

    # Balanced batch tiling: >= 2 grid steps when the batch allows (v7x has
    # 2 TensorCores), tiles a multiple of 8 sublanes, no blind rounding of B
    # up to a multiple of TB_MAX.
    bp = _round_up(B, SUBLANE)
    steps = max(2, _cdiv(bp, TB_MAX))
    tb = min(bp, _round_up(_cdiv(bp, steps), SUBLANE))
    grid_steps = _cdiv(bp, tb)
    bp = grid_steps * tb

    if bp != B:
        x = jnp.pad(x, ((0, bp - B), (0, 0)))

    batch_spec = lambda cols: pl.BlockSpec((tb, cols), lambda i: (i, 0))
    pinned_spec = lambda a: pl.BlockSpec(a.shape, lambda i: (0, 0))

    out_padded = pl.pallas_call(
        mlp_kernel,
        out_shape=jax.ShapeDtypeStruct((bp, out_size), jnp.float32),
        grid=(grid_steps,),
        in_specs=[
            batch_spec(in_size),                 # x streamed, last dim = full array dim
            pinned_spec(w1), pinned_spec(b1),    # weights/biases VMEM-resident
            pinned_spec(w2), pinned_spec(b2),
            pinned_spec(w3), pinned_spec(b3),
        ],
        out_specs=batch_spec(out_size),          # true-width output (masked vst OK)
        compiler_params=pltpu.CompilerParams(
            dimension_semantics=("parallel",),   # v7x: shard batch across 2 TCs
            vmem_limit_bytes=32 * 1024 * 1024,   # explicit (v5e default is 16 MiB)
        ),
    )(x, w1, b1, w2, b2, w3, b3)

    if bp != B:
        out_padded = out_padded[:B]
    return out_padded


def init_params(key, input_size, hidden1, hidden2, output_size):
    """Deterministic init mimicking nn.Linear's uniform(-1/sqrt(fan_in), +1/sqrt(fan_in))."""
    ks = jax.random.split(key, 6)

    def linear(kw, kb, fan_in, fan_out):
        bound = 1.0 / jnp.sqrt(fan_in)
        w = jax.random.uniform(kw, (fan_in, fan_out), jnp.float32, -bound, bound)
        b = jax.random.uniform(kb, (1, fan_out), jnp.float32, -bound, bound)
        return w, b

    w1, b1 = linear(ks[0], ks[1], input_size, hidden1)
    w2, b2 = linear(ks[2], ks[3], hidden1, hidden2)
    w3, b3 = linear(ks[4], ks[5], hidden2, output_size)
    return {"w1": w1, "b1": b1, "w2": w2, "b2": b2, "w3": w3, "b3": b3}


def reference_forward(x, p):
    h1 = jnp.maximum(x @ p["w1"] + p["b1"], 0.0)
    h2 = jnp.maximum(h1 @ p["w2"] + p["b2"], 0.0)
    return h2 @ p["w3"] + p["b3"]


if __name__ == "__main__":
    # Small shapes consistent with Net(input_size, hidden1, hidden2, output_size).
    batch, input_size, hidden1, hidden2, output_size = 8, 32, 64, 64, 16

    key = jax.random.PRNGKey(0)
    kx, kp = jax.random.split(key)
    x = jax.random.normal(kx, (batch, input_size), jnp.float32)
    params = init_params(kp, input_size, hidden1, hidden2, output_size)

    prepared = prepare_params(params)          # one-time bf16 weight prep
    out = net_forward(x, prepared)
    out = jax.block_until_ready(out)

    ref = reference_forward(x, params)
    assert out.shape == (batch, output_size)
    # bf16 matmul operands (f32 accumulation) vs f32 reference: loosened tolerance.
    assert jnp.allclose(out, ref, atol=5e-2, rtol=5e-2), "mismatch vs reference"

    print("KERNEL_OK")
</pallas_src>

<mosaic_0001>
module attributes {stable_mosaic.version = 11 : i64} {
  func.func @mlp_kernel(%arg0: i32, %arg1: memref<8x32xf32, #tpu.memory_space<vmem>>, %arg2: memref<32x64xbf16, #tpu.memory_space<vmem>>, %arg3: memref<1x64xf32, #tpu.memory_space<vmem>>, %arg4: memref<64x64xbf16, #tpu.memory_space<vmem>>, %arg5: memref<1x64xf32, #tpu.memory_space<vmem>>, %arg6: memref<64x16xbf16, #tpu.memory_space<vmem>>, %arg7: memref<1x16xf32, #tpu.memory_space<vmem>>, %arg8: memref<8x16xf32, #tpu.memory_space<vmem>>) attributes {dimension_semantics = [#tpu.dimension_semantics<parallel>], iteration_bounds = array<i64: 1>, scalar_prefetch = 0 : i64, scratch_operands = 0 : i64, tpu.core_type = #tpu.core_type<tc>, window_params = [{transform_indices = @transform_0, window_bounds = array<i64: 8, 32>}, {pipeline_mode = #tpu.pipeline_mode<synchronous>, transform_indices = @transform_1, window_bounds = array<i64: 32, 64>}, {pipeline_mode = #tpu.pipeline_mode<synchronous>, transform_indices = @transform_2, window_bounds = array<i64: 1, 64>}, {pipeline_mode = #tpu.pipeline_mode<synchronous>, transform_indices = @transform_3, window_bounds = array<i64: 64, 64>}, {pipeline_mode = #tpu.pipeline_mode<synchronous>, transform_indices = @transform_4, window_bounds = array<i64: 1, 64>}, {pipeline_mode = #tpu.pipeline_mode<synchronous>, transform_indices = @transform_5, window_bounds = array<i64: 64, 16>}, {pipeline_mode = #tpu.pipeline_mode<synchronous>, transform_indices = @transform_6, window_bounds = array<i64: 1, 16>}, {transform_indices = @transform_7, window_bounds = array<i64: 8, 16>}]} {
    %c0 = arith.constant 0 : index
    %c0_0 = arith.constant 0 : index
    %0 = vector.load %arg1[%c0, %c0_0] : memref<8x32xf32, #tpu.memory_space<vmem>>, vector<8x32xf32>
    %1 = arith.truncf %0 : vector<8x32xf32> to vector<8x32xbf16>
    %c0_1 = arith.constant 0 : index
    %c0_2 = arith.constant 0 : index
    %2 = vector.load %arg2[%c0_1, %c0_2] : memref<32x64xbf16, #tpu.memory_space<vmem>>, vector<32x64xbf16>
    %cst = arith.constant dense<0.000000e+00> : vector<8x64xf32>
    %3 = tpu.matmul %1, %2, %cst {dimension_numbers = #tpu.dot_dimension_numbers<[1], [0], [0], [1], [0, 0, 1, 1], [], []>} : vector<8x32xbf16>, vector<32x64xbf16>, vector<8x64xf32> -> vector<8x64xf32>
    %c0_3 = arith.constant 0 : index
    %c0_4 = arith.constant 0 : index
    %4 = vector.load %arg3[%c0_3, %c0_4] : memref<1x64xf32, #tpu.memory_space<vmem>>, vector<1x64xf32>
    %5 = vector.broadcast %4 : vector<1x64xf32> to vector<8x64xf32>
    %6 = arith.addf %3, %5 : vector<8x64xf32>
    %cst_5 = arith.constant 0.000000e+00 : f32
    %7 = vector.broadcast %cst_5 : f32 to vector<8x64xf32>
    %8 = arith.maximumf %6, %7 : vector<8x64xf32>
    %9 = arith.truncf %8 : vector<8x64xf32> to vector<8x64xbf16>
    %c0_6 = arith.constant 0 : index
    %c0_7 = arith.constant 0 : index
    %10 = vector.load %arg4[%c0_6, %c0_7] : memref<64x64xbf16, #tpu.memory_space<vmem>>, vector<64x64xbf16>
    %cst_8 = arith.constant dense<0.000000e+00> : vector<8x64xf32>
    %11 = tpu.matmul %9, %10, %cst_8 {dimension_numbers = #tpu.dot_dimension_numbers<[1], [0], [0], [1], [0, 0, 1, 1], [], []>} : vector<8x64xbf16>, vector<64x64xbf16>, vector<8x64xf32> -> vector<8x64xf32>
    %c0_9 = arith.constant 0 : index
    %c0_10 = arith.constant 0 : index
    %12 = vector.load %arg5[%c0_9, %c0_10] : memref<1x64xf32, #tpu.memory_space<vmem>>, vector<1x64xf32>
    %13 = vector.broadcast %12 : vector<1x64xf32> to vector<8x64xf32>
    %14 = arith.addf %11, %13 : vector<8x64xf32>
    %cst_11 = arith.constant 0.000000e+00 : f32
    %15 = vector.broadcast %cst_11 : f32 to vector<8x64xf32>
    %16 = arith.maximumf %14, %15 : vector<8x64xf32>
    %17 = arith.truncf %16 : vector<8x64xf32> to vector<8x64xbf16>
    %c0_12 = arith.constant 0 : index
    %c0_13 = arith.constant 0 : index
    %18 = vector.load %arg6[%c0_12, %c0_13] : memref<64x16xbf16, #tpu.memory_space<vmem>>, vector<64x16xbf16>
    %cst_14 = arith.constant dense<0.000000e+00> : vector<8x16xf32>
    %19 = tpu.matmul %17, %18, %cst_14 {dimension_numbers = #tpu.dot_dimension_numbers<[1], [0], [0], [1], [0, 0, 1, 1], [], []>} : vector<8x64xbf16>, vector<64x16xbf16>, vector<8x16xf32> -> vector<8x16xf32>
    %c0_15 = arith.constant 0 : index
    %c0_16 = arith.constant 0 : index
    %20 = vector.load %arg7[%c0_15, %c0_16] : memref<1x16xf32, #tpu.memory_space<vmem>>, vector<1x16xf32>
    %21 = vector.broadcast %20 : vector<1x16xf32> to vector<8x16xf32>
    %22 = arith.addf %19, %21 : vector<8x16xf32>
    %c0_17 = arith.constant 0 : index
    %c0_18 = arith.constant 0 : index
    %23 = vector.load %arg8[%c0_17, %c0_18] : memref<8x16xf32, #tpu.memory_space<vmem>>, vector<8x16xf32>
    tpu.vector_store %arg8[%c0_17, %c0_18], %22 {strides = array<i32>} : memref<8x16xf32, #tpu.memory_space<vmem>>, vector<8x16xf32>,
    return
  }
  func.func @transform_0(%arg0: i32) -> (i32, i32) {
    %c0_i32 = arith.constant 0 : i32
    %c0_i32_0 = arith.constant 0 : i32
    return %arg0, %c0_i32 : i32, i32
  }
  func.func @transform_1(%arg0: i32) -> (i32, i32) {
    %c0_i32 = arith.constant 0 : i32
    %c0_i32_0 = arith.constant 0 : i32
    %c0_i32_1 = arith.constant 0 : i32
    return %c0_i32, %c0_i32_0 : i32, i32
  }
  func.func @transform_2(%arg0: i32) -> (i32, i32) {
    %c0_i32 = arith.constant 0 : i32
    %c0_i32_0 = arith.constant 0 : i32
    %c0_i32_1 = arith.constant 0 : i32
    return %c0_i32, %c0_i32_0 : i32, i32
  }
  func.func @transform_3(%arg0: i32) -> (i32, i32) {
    %c0_i32 = arith.constant 0 : i32
    %c0_i32_0 = arith.constant 0 : i32
    %c0_i32_1 = arith.constant 0 : i32
    return %c0_i32, %c0_i32_0 : i32, i32
  }
  func.func @transform_4(%arg0: i32) -> (i32, i32) {
    %c0_i32 = arith.constant 0 : i32
    %c0_i32_0 = arith.constant 0 : i32
    %c0_i32_1 = arith.constant 0 : i32
    return %c0_i32, %c0_i32_0 : i32, i32
  }
  func.func @transform_5(%arg0: i32) -> (i32, i32) {
    %c0_i32 = arith.constant 0 : i32
    %c0_i32_0 = arith.constant 0 : i32
    %c0_i32_1 = arith.constant 0 : i32
    return %c0_i32, %c0_i32_0 : i32, i32
  }
  func.func @transform_6(%arg0: i32) -> (i32, i32) {
    %c0_i32 = arith.constant 0 : i32
    %c0_i32_0 = arith.constant 0 : i32
    %c0_i32_1 = arith.constant 0 : i32
    return %c0_i32, %c0_i32_0 : i32, i32
  }
  func.func @transform_7(%arg0: i32) -> (i32, i32) {
    %c0_i32 = arith.constant 0 : i32
    %c0_i32_0 = arith.constant 0 : i32
    return %arg0, %c0_i32 : i32, i32
  }
}

</mosaic_0001>

<bundles_post_ra>
// kernel: tpu_custom_call.1
= control target key start
LH: loop header
LB: loop body
LE: loop exit
PB: predicated region body
PF: predicated region fallthrough
CT: control target
= control target key end

     0   :  { %12 = vsyncpa [#allocation3], 0  ;;  %s530_s0 = inlined_call_operand.hbm [shape: f32[8,32], index: 0, kind: input, shape index: {}]   ;;  %s531_s1 = inlined_call_operand.vmem [shape: bf16[32,64], index: 1, kind: input, shape index: {}]   ;;  %s532_s2 = inlined_call_operand.vmem [shape: f32[1,64], index: 2, kind: input, shape index: {}]   ;;  %s533_s3 = inlined_call_operand.vmem [shape: bf16[64,64], index: 3, kind: input, shape index: {}]   ;;  %s534_s4 = inlined_call_operand.vmem [shape: f32[1,64], index: 4, kind: input, shape index: {}]   ;;  %s535_s5 = inlined_call_operand.vmem [shape: bf16[64,16], index: 5, kind: input, shape index: {}]   ;;  %s536_s6 = inlined_call_operand.vmem [shape: f32[1,16], index: 6, kind: input, shape index: {}]   ;;  %s537_s7 = inlined_call_operand.hbm [shape: f32[8,16], index: 7, kind: output, shape index: {}]  }
   0x1   :  { %13 = vsyncpa [#allocation4], 0  ;;  %s418_s24 = smov [#allocation2]   ;;  %s370_s28 = scalar_lea.hbm %s530_s0, 128 }
   0x2   :  { %s20_s25 = sshll.u32 %s418_s24, 4  ;;  %p371_p0 = scmp.ne.s32.totalorder %s530_s0, %s370_s28  ;;  %s21_s25 = int_to_ptr.vmem [resolvable:$true] %s20_s25 }
   0x3   :  { %p374_p1 = scmp.lt.u32.totalorder %s370_s28, %s530_s0 }
   0x5   :  { %p376_p2 = pnand %p374_p1, %p371_p0 }
   0x7   :  { %379 = shalt.err (!%p376_p2)
}
   0x8   :  { %s380_s10 = scalar_lea.vmem %s21_s25, 128  ;;  %p385_p4 = scmp.lt.s32.totalorder %s21_s25, %s21_s25 }
   0x9   :  { %p381_p3 = scmp.ne.s32.totalorder %s21_s25, %s380_s10  ;;  %p386_p5 = scmp.lt.s32.totalorder %s380_s10, %s380_s10 }
   0xb   :  { %p387_p6 = por %p386_p5, %p385_p4 }
   0xd   :  { %p388_p7 = pnand %p387_p6, %p381_p3 }
   0xf   :  { %391 = shalt.err (!%p388_p7)
}
  0x10   :  { %23 = dma.hbm_to_vmem [thread:$0]  %s530_s0, 128, %s21_s25, [#allocation3]  }
  0x11   :  { %414 = dma.done.wait [#allocation3], 128  }
  0x12   :  { %415 = vsyncadd [#allocation3], 4294967168  ;;  %v419_v0 = vmov 0.0   ;;  %vm420_vm0 = vmmov 0   ;;  %v360_v1 = vld [vmem:[%s531_s1] sm:$0xff]   ;;  %v361_v2 = vld [vmem:[%s531_s1 + $0x8] sm:$0xff]  }
  0x13   :  { %324 = vmatprep.subr.bf16.mxu0 %v419_v0  ;;  %328 = vmatprep.mubr.msk.bf16.mxu0 %vm420_vm0, %v419_v0  ;;  %v40_v3 = vld [vmem:[#allocation2] sm:$0xff]  ;;  %vm65_vm1 = vcmask 261120   ;;  %v363_v5 = vld [vmem:[%s533_s3 + $0x8] sm:$0xff]   ;;  %v364_v7 = vld [vmem:[%s533_s3 + $0x10] sm:$0xff]   ;;  %vm150_vm2 = vcmask 523264   ;;  %s421_s12 = smov [#allocation5]  }
  0x14   :  { %332 = vmatprep.subr.bf16.mxu1 %v419_v0  ;;  %340 = vmatprep.mubr.msk.bf16.mxu1 %vm420_vm0, %v419_v0  ;;  %v362_v4 = vld [vmem:[%s533_s3] sm:$0xff]   ;;  %v41_v6 = vpack.c.bf16 %v40_v3, %v40_v3  ;;  %v365_v8 = vld [vmem:[%s533_s3 + $0x18] sm:$0xff]   ;;  %v367_v10 = vld [vmem:[%s535_s5 + $0x8] sm:$0xff]   ;;  %vm278_vm3 = vcmask 130048  }
  0x15   :  { %325 = vmatpush3.bf16.msra.mxu0 %v360_v1  ;;  %333 = vmatpush3.bf16.msra.mxu1 %v362_v4  ;;  %v366_v9 = vld [vmem:[%s535_s5] sm:$0xff]   ;;  %v368_v19 = vld [vmem:[%s535_s5 + $0x10] sm:$0xff]   ;;  %v369_v20 = vld [vmem:[%s535_s5 + $0x18] sm:$0xff]   ;;  %s286_s5 = sshll.u32 %s421_s12, 4  ;;  %s287_s5 = int_to_ptr.vmem [resolvable:$true] %s286_s5 }
  0x16   :  { %326 = vmatprep.subr.bf16.mxu0 %v419_v0  ;;  %334 = vmatprep.subr.bf16.mxu1 %v419_v0  ;;  %v295_v11 = vld [vmem:[%s532_s2] ss:$0 sm:$0xff]  ;;  %p397_p9 = scmp.lt.s32.totalorder %s287_s5, %s287_s5 }
  0x17   :  { %v299_v21 = vld [vmem:[%s534_s4] ss:$0 sm:$0xff]  ;;  %s392_s4 = scalar_lea.vmem %s287_s5, 128 }
  0x18   :  { %v305_v29 = vld [vmem:[%s536_s6] ss:$0 sm:$0xff]  ;;  %p393_p8 = scmp.ne.s32.totalorder %s287_s5, %s392_s4  ;;  %p398_p10 = scmp.lt.s32.totalorder %s392_s4, %s392_s4 }
  0x19   :  { %327 = vmatpush3.bf16.msra.mxu0 %v361_v2  ;;  %335 = vmatpush3.bf16.msra.mxu1 %v363_v5 }
  0x1a   :  { %344 = vmatprep.subr.bf16.mxu0 %v419_v0  ;;  %336 = vmatprep.subr.bf16.mxu1 %v419_v0  ;;  %p399_p11 = por %p398_p10, %p397_p9 }
  0x1c   :  { %329 = vmatmul.mubr.msk.bf16.vlgmr.msra.gmra.mrb[0].mxu0 %vm65_vm1, %v41_v6  ;;  %p400_p12 = pnand %p399_p11, %p393_p8 }
  0x1d   :  { %352 = vmatprep.mubr.msk.bf16.mxu0 %vm420_vm0, %v419_v0  ;;  %337 = vmatpush3.bf16.msra.mxu1 %v364_v7 }
  0x1e   :  { %338 = vmatprep.subr.bf16.mxu1 %v419_v0  ;;  %345 = vmatpush3.bf16.msra.mxu0 %v366_v9 }
  0x1f   :  { %346 = vmatprep.subr.bf16.mxu0 %v419_v0 }
  0x21   :  { %339 = vmatpush3.bf16.msra.mxu1 %v365_v8 }
  0x22   :  { %347 = vmatpush3.bf16.msra.mxu0 %v367_v10 }
  0x23   :  { %348 = vmatprep.subr.bf16.mxu0 %v419_v0 }
  0x26   :  { %349 = vmatpush3.bf16.msra.mxu0 %v368_v19 }
  0x27   :  { %350 = vmatprep.subr.bf16.mxu0 %v419_v0 }
  0x2a   :  { %351 = vmatpush3.bf16.msra.mxu0 %v369_v20 }
  0xef   :  { %v103_v12 = vpop.f32.mrb[0].mxu0 }
  0xf0   :  { %v104_v13 = vadd.f32 %v295_v11, %v103_v12  ;;  %v330_v14 = vpop.f32.mrb[1].mxu0 }
  0xf1   :  { %v106_v15 = vpop.f32.mrb[2].mxu0 }
  0xf2   :  { %v109_v16 = vmax.f32 %v104_v13, 0.0  ;;  %v331_v17 = vpop.f32.mrb[3].mxu0 }
  0xf4   :  { %v110_v18 = vpack.c.bf16 %v109_v16, %v109_v16 }
  0xf6   :  { %341 = vmatmul.mubr.msk.bf16.vlgmr.msra.gmra.mrb[0].mxu1 %vm150_vm2, %v110_v18 }
 0x1c9   :  { %v188_v22 = vpop.f32.mrb[0].mxu1 }
 0x1ca   :  { %v189_v23 = vadd.f32 %v299_v21, %v188_v22  ;;  %v342_v24 = vpop.f32.mrb[1].mxu1 }
 0x1cb   :  { %v191_v25 = vpop.f32.mrb[2].mxu1 }
 0x1cc   :  { %v194_v26 = vmax.f32 %v189_v23, 0.0  ;;  %v343_v27 = vpop.f32.mrb[3].mxu1 }
 0x1ce   :  { %v195_v28 = vpack.c.bf16 %v194_v26, %v194_v26 }
 0x1d0   :  { %353 = vmatmul.mubr.msk.bf16.vlgmr.msra.gmra.mrb[4].mxu0 %vm150_vm2, %v195_v28 }
 0x2a3   :  { %v272_v30 = vpop.f32.mrb[4].mxu0 }
 0x2a4   :  { %v273_v31 = vadd.f32 %v305_v29, %v272_v30  ;;  %v354_v32 = vpop.f32.mrb[5].mxu0 }
 0x2a5   :  { %v275_v33 = vpop.f32.mrb[6].mxu0 }
 0x2a6   :  { %v355_v34 = vpop.f32.mrb[7].mxu0  ;;  %279 = vst.msk [vmem:[#allocation5] sm:$0xff] %vm278_vm3, %v273_v31 }
 0x2a7   :  { %403 = shalt.err (!%p400_p12)
}
 0x2a8   :  { %s404_s6 = scalar_lea.hbm %s537_s7, 128 }
 0x2a9   :  { %p405_p13 = scmp.ne.s32.totalorder %s537_s7, %s404_s6  ;;  %p408_p0 = scmp.lt.u32.totalorder %s404_s6, %s537_s7 }
 0x2ab   :  { %p410_p1 = pnand %p408_p0, %p405_p13 }
 0x2ad   :  { %413 = shalt.err (!%p410_p1)
}
 0x2ae   :  { %289 = dma.vmem_to_hbm [thread:$0]  %s287_s5, 128, %s537_s7, [#allocation4]  }
 0x2af   :  { %416 = dma.done.wait [#allocation4], 128  }
 0x2b0   :  { %417 = vsyncadd [#allocation4], 4294967168 }
 0x2b1   :  { %293 = vsyncpa [#allocation3], 1 }
 0x2b2   :  { %294 = vsyncpa [#allocation4], 1 }

</bundles_post_ra>
